<compile_context>
chip_gen: v5e
topology: v5e:2x2
jax: 0.10.0
libtpu: 0.0.40
codegen_flags: <defaults>
</compile_context>

<pallas_src>
import jax
import jax.numpy as jnp
from jax.experimental import pallas as pl
from jax.experimental.pallas import tpu as pltpu


def _bilinear_matrix(in_size: int, out_size: int) -> jnp.ndarray:
    """(in_size, out_size) matrix M with y_out = x_in @ M, matching PyTorch
    bilinear upsampling with align_corners=False (half-pixel centers,
    edge-clamped): src = max((dst + 0.5) * in/out - 0.5, 0)."""
    scale = in_size / out_size
    dst = jnp.arange(out_size, dtype=jnp.float32)
    src = jnp.maximum((dst + 0.5) * scale - 0.5, 0.0)
    i0 = jnp.clip(jnp.floor(src).astype(jnp.int32), 0, in_size - 1)
    i1 = jnp.minimum(i0 + 1, in_size - 1)
    w1 = src - i0.astype(jnp.float32)
    w0 = 1.0 - w1
    rows = jnp.arange(in_size, dtype=jnp.int32)[:, None]        # (in, 1)
    m = (w0[None, :] * (rows == i0[None, :])
         + w1[None, :] * (rows == i1[None, :]))                 # (in, out)
    return m.astype(jnp.float32)


def _interleaved_w_matrix(W: int, Wo: int, dtype) -> jnp.ndarray:
    """(2W, 2*Wo) complex-interleaved W-interp matrix: M_il[2i+c, 2j+c] = Mw[i, j].
    Columns come out already in the final (..., Wo, 2) flattened layout."""
    mw = _bilinear_matrix(W, Wo)                                 # (W, Wo)
    eye2 = jnp.eye(2, dtype=jnp.float32)
    m_il = (mw[:, None, :, None] * eye2[None, :, None, :]).reshape(2 * W, 2 * Wo)
    return m_il.astype(dtype)


def _upsample2x_kernel(mw_ref, mh_ref, x_ref, o_ref):
    """One tile: x (tb, H, 2W) -> o (tb, 2H, 4W), final interleaved layout.

    Per plane, two MXU matmuls with f32 accumulation:
        z = x_i @ Mw_il : (H, 2W) @ (2W, 4W) -> (H, 4W)   (W axis, complex in lanes)
        y = Mh^T @ z    : (2H, H) @ (H, 4W)  -> (2H, 4W)  (H axis)
    """
    tb = x_ref.shape[0]

    def body(i, carry):
        z = jnp.dot(x_ref[i], mw_ref[...], preferred_element_type=jnp.float32)
        z = z.astype(mh_ref.dtype)                 # bf16 inputs stay bf16 on the MXU
        y = jnp.dot(mh_ref[...], z, preferred_element_type=jnp.float32)
        o_ref[i] = y.astype(o_ref.dtype)
        return carry

    # Short fixed trip counts are fully unrolled for LLO scheduling visibility.
    jax.lax.fori_loop(0, tb, body, 0, unroll=bool(tb <= 8))


def _vmem_limit_bytes() -> int:
    """~Half of physical VMEM: 64 MiB on v5e/v6e (128 MiB), 32 MiB on v7x (64 MiB)."""
    cap = 128 * 1024 * 1024
    try:
        info = pltpu.get_tpu_info()
        cap = int(getattr(info, "vmem_capacity_bytes", cap) or cap)
    except Exception:
        pass
    return min(cap // 2, 96 * 1024 * 1024)


def _choose_tile_b(B: int, H: int, W: int, itemsize: int, budget_bytes: int) -> int:
    """Largest divisor of B whose double-buffered in/out tiles fit the budget,
    capped so the grid has >= 2 (preferably an even number of) steps."""
    per_plane = (2 * H * (2 * W) + 2 * (2 * H) * (4 * W)) * itemsize
    tb_cap = max(1, min(B, budget_bytes // max(per_plane, 1)))
    if B >= 2:
        tb_cap = max(1, min(tb_cap, B // 2))      # >= 2 grid steps (v7x megacore)
    best, best_even = 1, 0
    for d in range(1, tb_cap + 1):
        if B % d == 0:
            best = d
            if (B // d) % 2 == 0:
                best_even = d
    return best_even if best_even else best


def complex_upsample_2x(x: jnp.ndarray, *, interpret: bool = False) -> jnp.ndarray:
    """ComplexUpsample forward: (N, C, H, W, 2) -> (N, C, 2H, 2W, 2)."""
    N, C, H, W, two = x.shape
    assert two == 2, "last axis must be (real, imag)"
    dtype = x.dtype
    Ho, Wo = 2 * H, 2 * W
    B = N * C

    # Zero-copy view: complex axis folded into the lane axis -> (B, H, 2W).
    xp = x.reshape(B, H, 2 * W)

    # Weights: native sub-32-bit dtype for the MXU (0.25/0.75/1.0 are exact),
    # f32 otherwise.  Both stay resident in VMEM across the grid.
    wdtype = dtype if jnp.dtype(dtype).itemsize < 4 else jnp.float32
    mw_il = _interleaved_w_matrix(W, Wo, wdtype)          # (2W, 2*Wo)
    mh_t = _bilinear_matrix(H, Ho).T.astype(wdtype)       # (Ho, H)

    vmem_limit = _vmem_limit_bytes()
    wsize = jnp.dtype(wdtype).itemsize
    weights_bytes = 2 * (mw_il.size + mh_t.size) * wsize         # worst-case dbl-buffered
    interm_bytes = (H * 4 * W + Ho * 4 * W) * 4                  # one plane's z + y in f32
    budget = max(int(0.75 * vmem_limit) - weights_bytes - interm_bytes, 1)

    tb = _choose_tile_b(B, H, W, jnp.dtype(dtype).itemsize, budget)
    grid = (B // tb,)

    out_flat = pl.pallas_call(
        _upsample2x_kernel,
        out_shape=jax.ShapeDtypeStruct((B, Ho, 2 * Wo), dtype),
        grid_spec=pltpu.PrefetchScalarGridSpec(
            num_scalar_prefetch=0,
            grid=grid,
            in_specs=[
                # Constant index maps -> weights stay resident, never re-DMA'd.
                pl.BlockSpec((2 * W, 2 * Wo), lambda b: (0, 0)),
                pl.BlockSpec((Ho, H), lambda b: (0, 0)),
                pl.BlockSpec((tb, H, 2 * W), lambda b: (b, 0, 0)),
            ],
            out_specs=pl.BlockSpec((tb, Ho, 2 * Wo), lambda b: (b, 0, 0)),
        ),
        compiler_params=pltpu.CompilerParams(
            dimension_semantics=("parallel",),
            vmem_limit_bytes=vmem_limit,
        ),
        interpret=interpret,
    )(mw_il, mh_t, xp)

    # (B, 2H, 4W) -> (N, C, 2H, 2W, 2): pure reshape, no data movement.
    return out_flat.reshape(N, C, Ho, Wo, 2)


def _ref_complex_upsample_2x(x: jnp.ndarray) -> jnp.ndarray:
    """Pure-JAX reference (PyTorch bilinear, align_corners=False)."""
    N, C, H, W, _ = x.shape
    mh = _bilinear_matrix(H, 2 * H)   # (H, 2H)
    mw = _bilinear_matrix(W, 2 * W)   # (W, 2W)
    y = jnp.einsum("ho,nchwr,wp->ncopr", mh, x.astype(jnp.float32), mw)
    return y.astype(x.dtype)


if __name__ == "__main__":
    key = jax.random.PRNGKey(0)
    # (N, C, H, W, 2) -- small, deterministic example
    x = jax.random.normal(key, (2, 4, 16, 16, 2), dtype=jnp.float32)

    out = jax.block_until_ready(complex_upsample_2x(x))

    ref = _ref_complex_upsample_2x(x)
    assert out.shape == (2, 4, 32, 32, 2), out.shape
    max_err = float(jnp.max(jnp.abs(out.astype(jnp.float32) - ref.astype(jnp.float32))))
    # MXU f32 matmuls may run through bf16 passes at default precision; the 2x
    # bilinear weights are exact, so error is bounded by input truncation.
    if not max_err < 5e-2:
        raise AssertionError(f"mismatch vs reference: max abs err = {max_err}")

    print("KERNEL_OK")
</pallas_src>

<mosaic_0001>
module attributes {stable_mosaic.version = 11 : i64} {
  func.func @_upsample2x_kernel(%arg0: i32, %arg1: memref<32x64xf32, #tpu.memory_space<vmem>>, %arg2: memref<32x16xf32, #tpu.memory_space<vmem>>, %arg3: memref<4x16x32xf32, #tpu.memory_space<vmem>>, %arg4: memref<4x32x64xf32, #tpu.memory_space<vmem>>) attributes {dimension_semantics = [#tpu.dimension_semantics<parallel>], iteration_bounds = array<i64: 2>, scalar_prefetch = 0 : i64, scratch_operands = 0 : i64, tpu.core_type = #tpu.core_type<tc>, window_params = [{pipeline_mode = #tpu.pipeline_mode<synchronous>, transform_indices = @transform_0, window_bounds = array<i64: 32, 64>}, {pipeline_mode = #tpu.pipeline_mode<synchronous>, transform_indices = @transform_1, window_bounds = array<i64: 32, 16>}, {transform_indices = @transform_2, window_bounds = array<i64: 4, 16, 32>}, {transform_indices = @transform_3, window_bounds = array<i64: 4, 32, 64>}]} {
    %c0_i32 = arith.constant 0 : i32
    %0 = arith.index_cast %c0_i32 : i32 to index
    %c0 = arith.constant 0 : index
    %c0_0 = arith.constant 0 : index
    %1 = vector.load %arg3[%0, %c0, %c0_0] : memref<4x16x32xf32, #tpu.memory_space<vmem>>, vector<1x16x32xf32>
    %2 = vector.shape_cast %1 : vector<1x16x32xf32> to vector<16x32xf32>
    %c0_1 = arith.constant 0 : index
    %c0_2 = arith.constant 0 : index
    %3 = vector.load %arg1[%c0_1, %c0_2] : memref<32x64xf32, #tpu.memory_space<vmem>>, vector<32x64xf32>
    %cst = arith.constant dense<0.000000e+00> : vector<16x64xf32>
    %4 = tpu.matmul %2, %3, %cst {dimension_numbers = #tpu.dot_dimension_numbers<[1], [0], [0], [1], [0, 0, 1, 1], [], []>} : vector<16x32xf32>, vector<32x64xf32>, vector<16x64xf32> -> vector<16x64xf32>
    %c0_3 = arith.constant 0 : index
    %c0_4 = arith.constant 0 : index
    %5 = vector.load %arg2[%c0_3, %c0_4] : memref<32x16xf32, #tpu.memory_space<vmem>>, vector<32x16xf32>
    %cst_5 = arith.constant dense<0.000000e+00> : vector<32x64xf32>
    %6 = tpu.matmul %5, %4, %cst_5 {dimension_numbers = #tpu.dot_dimension_numbers<[1], [0], [0], [1], [0, 0, 1, 1], [], []>} : vector<32x16xf32>, vector<16x64xf32>, vector<32x64xf32> -> vector<32x64xf32>
    %7 = arith.index_cast %c0_i32 : i32 to index
    %c0_6 = arith.constant 0 : index
    %c0_7 = arith.constant 0 : index
    %8 = vector.load %arg4[%7, %c0_6, %c0_7] : memref<4x32x64xf32, #tpu.memory_space<vmem>>, vector<1x32x64xf32>
    %9 = vector.shape_cast %8 : vector<1x32x64xf32> to vector<32x64xf32>
    %10 = vector.shape_cast %6 : vector<32x64xf32> to vector<1x32x64xf32>
    tpu.vector_store %arg4[%7, %c0_6, %c0_7], %10 {strides = array<i32>} : memref<4x32x64xf32, #tpu.memory_space<vmem>>, vector<1x32x64xf32>,
    %c1_i32 = arith.constant 1 : i32
    %11 = arith.index_cast %c1_i32 : i32 to index
    %c0_8 = arith.constant 0 : index
    %c0_9 = arith.constant 0 : index
    %12 = vector.load %arg3[%11, %c0_8, %c0_9] : memref<4x16x32xf32, #tpu.memory_space<vmem>>, vector<1x16x32xf32>
    %13 = vector.shape_cast %12 : vector<1x16x32xf32> to vector<16x32xf32>
    %c0_10 = arith.constant 0 : index
    %c0_11 = arith.constant 0 : index
    %14 = vector.load %arg1[%c0_10, %c0_11] : memref<32x64xf32, #tpu.memory_space<vmem>>, vector<32x64xf32>
    %cst_12 = arith.constant dense<0.000000e+00> : vector<16x64xf32>
    %15 = tpu.matmul %13, %14, %cst_12 {dimension_numbers = #tpu.dot_dimension_numbers<[1], [0], [0], [1], [0, 0, 1, 1], [], []>} : vector<16x32xf32>, vector<32x64xf32>, vector<16x64xf32> -> vector<16x64xf32>
    %c0_13 = arith.constant 0 : index
    %c0_14 = arith.constant 0 : index
    %16 = vector.load %arg2[%c0_13, %c0_14] : memref<32x16xf32, #tpu.memory_space<vmem>>, vector<32x16xf32>
    %cst_15 = arith.constant dense<0.000000e+00> : vector<32x64xf32>
    %17 = tpu.matmul %16, %15, %cst_15 {dimension_numbers = #tpu.dot_dimension_numbers<[1], [0], [0], [1], [0, 0, 1, 1], [], []>} : vector<32x16xf32>, vector<16x64xf32>, vector<32x64xf32> -> vector<32x64xf32>
    %18 = arith.index_cast %c1_i32 : i32 to index
    %c0_16 = arith.constant 0 : index
    %c0_17 = arith.constant 0 : index
    %19 = vector.load %arg4[%18, %c0_16, %c0_17] : memref<4x32x64xf32, #tpu.memory_space<vmem>>, vector<1x32x64xf32>
    %20 = vector.shape_cast %19 : vector<1x32x64xf32> to vector<32x64xf32>
    %21 = vector.shape_cast %17 : vector<32x64xf32> to vector<1x32x64xf32>
    tpu.vector_store %arg4[%18, %c0_16, %c0_17], %21 {strides = array<i32>} : memref<4x32x64xf32, #tpu.memory_space<vmem>>, vector<1x32x64xf32>,
    %c2_i32 = arith.constant 2 : i32
    %22 = arith.index_cast %c2_i32 : i32 to index
    %c0_18 = arith.constant 0 : index
    %c0_19 = arith.constant 0 : index
    %23 = vector.load %arg3[%22, %c0_18, %c0_19] : memref<4x16x32xf32, #tpu.memory_space<vmem>>, vector<1x16x32xf32>
    %24 = vector.shape_cast %23 : vector<1x16x32xf32> to vector<16x32xf32>
    %c0_20 = arith.constant 0 : index
    %c0_21 = arith.constant 0 : index
    %25 = vector.load %arg1[%c0_20, %c0_21] : memref<32x64xf32, #tpu.memory_space<vmem>>, vector<32x64xf32>
    %cst_22 = arith.constant dense<0.000000e+00> : vector<16x64xf32>
    %26 = tpu.matmul %24, %25, %cst_22 {dimension_numbers = #tpu.dot_dimension_numbers<[1], [0], [0], [1], [0, 0, 1, 1], [], []>} : vector<16x32xf32>, vector<32x64xf32>, vector<16x64xf32> -> vector<16x64xf32>
    %c0_23 = arith.constant 0 : index
    %c0_24 = arith.constant 0 : index
    %27 = vector.load %arg2[%c0_23, %c0_24] : memref<32x16xf32, #tpu.memory_space<vmem>>, vector<32x16xf32>
    %cst_25 = arith.constant dense<0.000000e+00> : vector<32x64xf32>
    %28 = tpu.matmul %27, %26, %cst_25 {dimension_numbers = #tpu.dot_dimension_numbers<[1], [0], [0], [1], [0, 0, 1, 1], [], []>} : vector<32x16xf32>, vector<16x64xf32>, vector<32x64xf32> -> vector<32x64xf32>
    %29 = arith.index_cast %c2_i32 : i32 to index
    %c0_26 = arith.constant 0 : index
    %c0_27 = arith.constant 0 : index
    %30 = vector.load %arg4[%29, %c0_26, %c0_27] : memref<4x32x64xf32, #tpu.memory_space<vmem>>, vector<1x32x64xf32>
    %31 = vector.shape_cast %30 : vector<1x32x64xf32> to vector<32x64xf32>
    %32 = vector.shape_cast %28 : vector<32x64xf32> to vector<1x32x64xf32>
    tpu.vector_store %arg4[%29, %c0_26, %c0_27], %32 {strides = array<i32>} : memref<4x32x64xf32, #tpu.memory_space<vmem>>, vector<1x32x64xf32>,
    %c3_i32 = arith.constant 3 : i32
    %33 = arith.index_cast %c3_i32 : i32 to index
    %c0_28 = arith.constant 0 : index
    %c0_29 = arith.constant 0 : index
    %34 = vector.load %arg3[%33, %c0_28, %c0_29] : memref<4x16x32xf32, #tpu.memory_space<vmem>>, vector<1x16x32xf32>
    %35 = vector.shape_cast %34 : vector<1x16x32xf32> to vector<16x32xf32>
    %c0_30 = arith.constant 0 : index
    %c0_31 = arith.constant 0 : index
    %36 = vector.load %arg1[%c0_30, %c0_31] : memref<32x64xf32, #tpu.memory_space<vmem>>, vector<32x64xf32>
    %cst_32 = arith.constant dense<0.000000e+00> : vector<16x64xf32>
    %37 = tpu.matmul %35, %36, %cst_32 {dimension_numbers = #tpu.dot_dimension_numbers<[1], [0], [0], [1], [0, 0, 1, 1], [], []>} : vector<16x32xf32>, vector<32x64xf32>, vector<16x64xf32> -> vector<16x64xf32>
    %c0_33 = arith.constant 0 : index
    %c0_34 = arith.constant 0 : index
    %38 = vector.load %arg2[%c0_33, %c0_34] : memref<32x16xf32, #tpu.memory_space<vmem>>, vector<32x16xf32>
    %cst_35 = arith.constant dense<0.000000e+00> : vector<32x64xf32>
    %39 = tpu.matmul %38, %37, %cst_35 {dimension_numbers = #tpu.dot_dimension_numbers<[1], [0], [0], [1], [0, 0, 1, 1], [], []>} : vector<32x16xf32>, vector<16x64xf32>, vector<32x64xf32> -> vector<32x64xf32>
    %40 = arith.index_cast %c3_i32 : i32 to index
    %c0_36 = arith.constant 0 : index
    %c0_37 = arith.constant 0 : index
    %41 = vector.load %arg4[%40, %c0_36, %c0_37] : memref<4x32x64xf32, #tpu.memory_space<vmem>>, vector<1x32x64xf32>
    %42 = vector.shape_cast %41 : vector<1x32x64xf32> to vector<32x64xf32>
    %43 = vector.shape_cast %39 : vector<32x64xf32> to vector<1x32x64xf32>
    tpu.vector_store %arg4[%40, %c0_36, %c0_37], %43 {strides = array<i32>} : memref<4x32x64xf32, #tpu.memory_space<vmem>>, vector<1x32x64xf32>,
    %c4_i32 = arith.constant 4 : i32
    return
  }
  func.func @transform_0(%arg0: i32) -> (i32, i32) {
    %c0_i32 = arith.constant 0 : i32
    %c0_i32_0 = arith.constant 0 : i32
    %c0_i32_1 = arith.constant 0 : i32
    return %c0_i32, %c0_i32_0 : i32, i32
  }
  func.func @transform_1(%arg0: i32) -> (i32, i32) {
    %c0_i32 = arith.constant 0 : i32
    %c0_i32_0 = arith.constant 0 : i32
    %c0_i32_1 = arith.constant 0 : i32
    return %c0_i32, %c0_i32_0 : i32, i32
  }
  func.func @transform_2(%arg0: i32) -> (i32, i32, i32) {
    %c0_i32 = arith.constant 0 : i32
    %c0_i32_0 = arith.constant 0 : i32
    %c0_i32_1 = arith.constant 0 : i32
    return %arg0, %c0_i32, %c0_i32_0 : i32, i32, i32
  }
  func.func @transform_3(%arg0: i32) -> (i32, i32, i32) {
    %c0_i32 = arith.constant 0 : i32
    %c0_i32_0 = arith.constant 0 : i32
    %c0_i32_1 = arith.constant 0 : i32
    return %arg0, %c0_i32, %c0_i32_0 : i32, i32, i32
  }
}

</mosaic_0001>

<bundles_post_ra>
// kernel: tpu_custom_call.1
= control target key start
LH: loop header
LB: loop body
LE: loop exit
PB: predicated region body
PF: predicated region fallthrough
CT: control target
= control target key end

     0   :  { %8 = vsyncpa [#allocation3], 0  ;;  %s1086_s0 = inlined_call_operand.vmem [shape: f32[32,64], index: 0, kind: input, shape index: {}]   ;;  %s1087_s1 = inlined_call_operand.vmem [shape: f32[32,16], index: 1, kind: input, shape index: {}]   ;;  %s1088_s2 = inlined_call_operand.hbm [shape: f32[8,16,32], index: 2, kind: input, shape index: {}]   ;;  %s1089_s3 = inlined_call_operand.hbm [shape: f32[8,32,64], index: 3, kind: output, shape index: {}]  }
   0x1   :  { %10 = vsyncpa [#allocation3 + $0x1], 0 }
   0x2   :  { %11 = vsyncpa [#allocation4], 0 }
   0x3   :  { %13 = vsyncpa [#allocation4 + $0x1], 0  ;;  %s865_s12 = smov 0   ;;  %s867_s13 = smov 0  }
   0x4   :  { %s869_s14 = smov 0   ;;  %s871_s15 = smov 0  }
   0x5 LB: > { %s886_s16 = sadd.s32 4294967295, %s839_s15   ;;  %s629_s17 = sadd.s32 4294967294, %s839_s15   ;;  %s839_s15 = sphi %s871_s15, %s1099_s15   ;;  %s835_s14 = sphi %s869_s14, %s1098_s14   ;;  %s831_s13 = sphi %s867_s13, %s1097_s13   ;;  %s827_s12 = sphi %s865_s12, %s1096_s12  }
   0x6   : > { %s890_s18 = sadd.s32 1, %s839_s15   ;;  %s68_s19 = sadd.s32 1, %s835_s14 }
   0x7   : > { %s65_s20 = ssub.s32 %s839_s15, %s890_s18  ;;  %p75_p0 = scmp.ne.s32.totalorder %s835_s14, %s831_s13 }
   0x8   : > { %p66_p1 = scmp.eq.s32.totalorder %s65_s20, 0  ;;  %p76_p2 = scmp.eq.s32.totalorder %s839_s15, 0 }
   0x9   : > { %p81_p3 = scmp.ne.s32.totalorder %s831_s13, %s827_s12  ;;  %p82_p4 = scmp.eq.s32.totalorder %s886_s16, 0 }
   0xa   : > { %s902_s21 = scalar_select %p66_p1, %s835_s14, %s68_s19  }
   0xb   : > { %p904_p5 = por %p76_p2, %p75_p0  ;;  %p908_p6 = por %p82_p4, %p81_p3 }
   0xc   : > { %p105_p7 = scmp.eq.s32.totalorder %s886_s16, 1  ;;  %p111_p8 = scmp.eq.s32.totalorder %s629_s17, 1 }
   0xd   : > { %p705_p10 = scmp.lt.s32.totalorder %s839_s15, 2  ;;  %s137_s26 = sand.u32 1, %s835_s14  }
   0xe   : > { %p915_p11 = por %p105_p7, %p75_p0  ;;  %p919_p12 = por %p111_p8, %p81_p3 }
   0xf   : > { %s688_s27 = sshll.u32 %s839_s15, 6  ;;  %s632_s28 = sshll.u32 %s137_s26, 6 }
  0x10   : > { %s147_s4 = scalar_lea.hbm %s1088_s2, %s688_s27  ;;  %s141_s6 = scalar_lea.vmem [#allocation2], %s632_s28 }
  0x11   : > { %s148_s5 = sshll.u32 %s147_s4, 4  ;;  %s150_s7 = sshll.u32 %s141_s6, 4  ;;  %s149_s5 = int_to_ptr.hbm [resolvable:$true] %s148_s5  ;;  %s151_s7 = int_to_ptr.vmem [resolvable:$true] %s150_s7 }
  0x12   : > { %p930_p13 = pnand %p705_p10, %p904_p5  ;;  %p636_p0 = scmp.ge.s32.totalorder %s839_s15, 1 }
  0x13   : > { %p158_p1 = scmp.lt.s32.totalorder %s839_s15, 3  ;;  %s138_s9 = scalar_lea.sflag [#allocation3], %s137_s26 }
  0x14   : > { %s743_s10 = sshra.s32 %s149_s5, 4  ;;  %p747_p3 = pneg %p930_p13  ;;  %s744_s10 = int_to_ptr.hbm [resolvable:$true] %s743_s10 }
  0x15   : > { %s745_s11 = scalar_lea.hbm %s744_s10, 64  ;;  %s750_s20 = scalar_lea.hbm %s1088_s2, 128 }
  0x16   : > { %p746_p2 = scmp.ne.s32.totalorder %s744_s10, %s745_s11  ;;  %p751_p5 = scmp.lt.s32.totalorder %s744_s10, %s1088_s2 }
  0x17   : > { %p752_p8 = scmp.lt.s32.totalorder %s750_s20, %s745_s11 }
  0x18   : > { %p748_p4 = pnand %p747_p3, %p746_p2 }
  0x19   : > { %p753_p10 = por %p752_p8, %p751_p5 }
  0x1a   : > { %p749_p7 = pneg %p748_p4 }
  0x1c   : > { %p754_p9 = pnand %p753_p10, %p749_p7 }
  0x1e   : > { %757 = shalt.err (!%p754_p9)
}
  0x1f   : > { %s841_s26 = smov 128   ;;  %s842_s28 = smov 8  }
  0x20   : > { %700 = dma.hbm_to_vmem [thread:$0]  (!%p930_p13), %s149_s5, 1024, %s151_s7, %s138_s9, %s841_s26, %s841_s26, %s842_s28  }
  0x21   : > { %p159_p2 = pnand %p636_p0, %p158_p1 }
  0x22   : > { %s951_s29 = sand.u32 (!%p159_p2), 1, %s831_s13  }
  0x23   : > { %162 = sbr.rel (%p159_p2) target bundleno = 515 (0x203), region = 32  ;;  %s637_s30 = sshll.u32 (!%p159_p2), %s951_s29, 6 }
  0x24   : > { %s165_s4 = scalar_lea.sflag (!%p159_p2), [#allocation3], %s951_s29  ;;  %s955_s6 = scalar_lea.vmem (!%p159_p2), [#allocation2], %s637_s30 }
  0x28   : > { %818 = dma.done.wait (%p908_p6), %s165_s4, 1024  }
  0x29   : > { %820 = vsyncadd (%p908_p6), %s165_s4, 4294966272  ;;  %v199_v0 = vld [vmem:[%s1086_s0 + $0x18] sm:$0xff]  ;;  %v198_v1 = vld [vmem:[%s1086_s0 + $0x10] sm:$0xff]  ;;  %vm200_vm0 = vcmask 261120   ;;  %vm234_vm1 = vcmask 130048   ;;  %s638_s5 = sshll.u32 %s951_s29, 7 }
  0x2a   : > { %219 = vmatpush.msra.mxu0 %v199_v0  ;;  %306 = vmatpush.msra.mxu2 %v199_v0  ;;  %v197_v2 = vld [vmem:[%s1086_s0 + $0x8] sm:$0xff]  ;;  %v196_v3 = vld [vmem:[%s1086_s0] sm:$0xff]  ;;  %v645_v5 = vld [vmem:[%s955_s6 + $0x10] sm:$0xff]  ;;  %vm276_vm2 = vcmask 523264   ;;  %s1010_s7 = scalar_lea.vmem [#allocation5], %s638_s5  ;;  %s540_s17 = scalar_lea.sflag [#allocation4], %s951_s29 }
  0x2b   : > { %v194_v4 = vld [vmem:[%s955_s6] sm:$0xff]  ;;  %v195_v6 = vld [vmem:[%s955_s6 + $0x8] sm:$0xff]  ;;  %v646_v7 = vld [vmem:[%s955_s6 + $0x18] sm:$0xff]  ;;  %s553_s11 = sshll.u32 %s1010_s7, 4  ;;  %s793_s27 = scalar_lea.hbm %s1089_s3, 256  ;;  %s554_s11 = int_to_ptr.vmem [resolvable:$true] %s553_s11 }
  0x2c   : > { %220 = vmatpush.msra.mxu0 %v198_v1  ;;  %307 = vmatpush.msra.mxu2 %v198_v1  ;;  %v230_v11 = vld [vmem:[%s1087_s1] sm:$0xff]  ;;  %v231_v13 = vld [vmem:[%s1087_s1 + $0x8] sm:$0xff]  ;;  %v232_v15 = vld [vmem:[%s1087_s1 + $0x10] sm:$0xff] }
  0x2d   : > { %v657_v14 = vld [vmem:[%s955_s6 + $0x20] sm:$0xff]  ;;  %v658_v16 = vld [vmem:[%s955_s6 + $0x28] sm:$0xff]  ;;  %v233_v17 = vld [vmem:[%s1087_s1 + $0x18] sm:$0xff] }
  0x2e   : > { %221 = vmatpush.msra.mxu0 %v197_v2  ;;  %308 = vmatpush.msra.mxu2 %v197_v2  ;;  %v669_v18 = vld [vmem:[%s955_s6 + $0x30] sm:$0xff]  ;;  %v670_v19 = vld [vmem:[%s955_s6 + $0x38] sm:$0xff]  ;;  %s690_s6 = sshll.u32 %s886_s16, 7 }
  0x2f   : > { %s552_s10 = scalar_lea.hbm %s1089_s3, %s690_s6 }
  0x30   : > { %222 = vmatpush.msra.mxu0 %v196_v3  ;;  %309 = vmatpush.msra.mxu2 %v196_v3  ;;  %s555_s23 = sshll.u32 %s552_s10, 4  ;;  %s556_s23 = int_to_ptr.hbm [resolvable:$true] %s555_s23 }
  0x31   : > { %639 = vmatmul.msk.f32.vlgmr.msra.gmra.mxu0 %vm200_vm0, %v194_v4  ;;  %647 = vmatmul.msk.f32.vlgmr.msra.gmra.mxu2 %vm200_vm0, %v645_v5  ;;  %s787_s19 = sshra.s32 %s556_s23, 4  ;;  %s788_s19 = int_to_ptr.hbm [resolvable:$true] %s787_s19 }
  0x32   : > { %s789_s20 = scalar_lea.hbm %s788_s19, 128  ;;  %p794_p0 = scmp.lt.s32.totalorder %s788_s19, %s1089_s3 }
  0x33   : > { %p790_p6 = scmp.ne.s32.totalorder %s788_s19, %s789_s20  ;;  %p795_p1 = scmp.lt.s32.totalorder %s793_s27, %s789_s20 }
  0x35   : > { %p791_p9 = pnand %p790_p6, %p915_p11  ;;  %p796_p3 = por %p795_p1, %p794_p0 }
  0x37   : > { %p792_p13 = pneg %p791_p9 }
  0x39   : > { %640 = vmatmul.msk.f32.gmra.mxu0 %vm200_vm0, %v195_v6  ;;  %648 = vmatmul.msk.f32.gmra.mxu2 %vm200_vm0, %v646_v7  ;;  %p797_p4 = pnand %p796_p3, %p792_p13 }
  0xae   : > { %v224_v8 = vpop.f32.mrf.mxu0 }
  0xb4   : > { %v311_v9 = vpop.f32.mrf.mxu2 }
  0xb6   : > { %v227_v10 = vpop.f32.mrf.mxu0 }
  0xb7   : > { %261 = vmatpush.msra.mxu1 %v227_v10 }
  0xb9   : > { %262 = vmatpush.msra.mxu1 %v224_v8 }
  0xba   : > { %641 = vmatmul.msk.f32.vlgmr.msra.gmra.mxu1 %vm234_vm1, %v230_v11 }
  0xbb   : > { %478 = vmatpush.msrb.mxu1 %v199_v0 }
  0xbc   : > { %v314_v12 = vpop.f32.mrf.mxu2 }
  0xbd   : > { %347 = vmatpush.msrb.mxu0 %v314_v12  ;;  %691 = vmatpush.msra.mxu3 %v314_v12 }
  0xbe   : > { %479 = vmatpush.msrb.mxu1 %v198_v1 }
  0xbf   : > { %348 = vmatpush.msrb.mxu0 %v311_v9  ;;  %692 = vmatpush.msra.mxu3 %v311_v9 }
  0xc0   : > { %649 = vmatmul.msk.f32.vlgmr.msrb.gmra.mxu0 %vm234_vm1, %v230_v11  ;;  %480 = vmatpush.msrb.mxu1 %v197_v2 }
  0xc1   : > { %392 = vmatpush.msra.mxu0 %v199_v0  ;;  %650 = vmatmul.msk.f32.vlgmr.msra.gmra.mxu3 %vm234_vm1, %v231_v13 }
  0xc2   : > { %642 = vmatmul.msk.f32.gmra.mxu1 %vm234_vm1, %v231_v13 }
  0xc3   : > { %393 = vmatpush.msra.mxu0 %v198_v1  ;;  %481 = vmatpush.msrb.mxu1 %v196_v3 }
  0xc5   : > { %394 = vmatpush.msra.mxu0 %v197_v2 }
  0xc7   : > { %395 = vmatpush.msra.mxu0 %v196_v3 }
  0xc8   : > { %659 = vmatmul.msk.f32.vlgmr.msra.gmra.mxu0 %vm200_vm0, %v657_v14 }
  0xc9   : > { %651 = vmatmul.msk.f32.gmra.mxu3 %vm234_vm1, %v232_v15 }
  0xca   : > { %643 = vmatmul.msk.f32.gmra.mxu1 %vm234_vm1, %v232_v15 }
  0xd0   : > { %660 = vmatmul.msk.f32.gmra.mxu0 %vm200_vm0, %v658_v16 }
  0xd1   : > { %652 = vmatmul.msk.f32.gmra.mxu3 %vm234_vm1, %v233_v17 }
  0xd2   : > { %644 = vmatmul.msk.f32.gmra.mxu1 %vm234_vm1, %v233_v17 }
  0xda   : > { %671 = vmatmul.msk.f32.vlgmr.msrb.gmra.mxu1 %vm200_vm0, %v669_v18 }
  0xe2   : > { %672 = vmatmul.msk.f32.gmra.mxu1 %vm200_vm0, %v670_v19 }
 0x137   : > { %v264_v20 = vpop.f32.mrf.mxu1 }
 0x138   : > { %277 = vst.msk [vmem:[%s1010_s7] sm:$0xff] %vm276_vm2, %v264_v20 }
 0x13d   : > { %v350_v21 = vpop.f32.mrf.mxu0 }
 0x13e   : > { %653 = vst.msk [vmem:[%s1010_s7 + $0x20] sm:$0xff] %vm276_vm2, %v350_v21 }
 0x13f   : > { %v267_v22 = vpop.f32.mrf.mxu1 }
 0x140   : > { %278 = vst.msk [vmem:[%s1010_s7 + $0x8] sm:$0xff] %vm276_vm2, %v267_v22 }
 0x144   : > { %v353_v28 = vpop.f32.mrf.mxu3 }
 0x145   : > { %v397_v23 = vpop.f32.mrf.mxu0  ;;  %654 = vst.msk [vmem:[%s1010_s7 + $0x28] sm:$0xff] %vm276_vm2, %v353_v28 }
 0x147   : > { %v270_v24 = vpop.f32.mrf.mxu1 }
 0x148   : > { %279 = vst.msk [vmem:[%s1010_s7 + $0x10] sm:$0xff] %vm276_vm2, %v270_v24 }
 0x14c   : > { %v356_v30 = vpop.f32.mrf.mxu3 }
 0x14d   : > { %v400_v25 = vpop.f32.mrf.mxu0  ;;  %655 = vst.msk [vmem:[%s1010_s7 + $0x30] sm:$0xff] %vm276_vm2, %v356_v30 }
 0x14e   : > { %433 = vmatpush.msrb.mxu2 %v400_v25 }
 0x14f   : > { %v273_v26 = vpop.f32.mrf.mxu1 }
 0x150   : > { %280 = vst.msk [vmem:[%s1010_s7 + $0x18] sm:$0xff] %vm276_vm2, %v273_v26  ;;  %434 = vmatpush.msrb.mxu2 %v397_v23 }
 0x151   : > { %661 = vmatmul.msk.f32.vlgmr.msrb.gmra.mxu2 %vm234_vm1, %v230_v11 }
 0x154   : > { %v359_v31 = vpop.f32.mrf.mxu3 }
 0x155   : > { %656 = vst.msk [vmem:[%s1010_s7 + $0x38] sm:$0xff] %vm276_vm2, %v359_v31 }
 0x157   : > { %v483_v27 = vpop.f32.mrf.mxu1 }
 0x159   : > { %662 = vmatmul.msk.f32.gmra.mxu2 %vm234_vm1, %v231_v13 }
 0x15f   : > { %v486_v29 = vpop.f32.mrf.mxu1 }
 0x160   : > { %519 = vmatpush.msrb.mxu3 %v486_v29 }
 0x161   : > { %663 = vmatmul.msk.f32.gmra.mxu2 %vm234_vm1, %v232_v15 }
 0x162   : > { %520 = vmatpush.msrb.mxu3 %v483_v27 }
 0x163   : > { %673 = vmatmul.msk.f32.vlgmr.msrb.gmra.mxu3 %vm234_vm1, %v230_v11 }
 0x169   : > { %664 = vmatmul.msk.f32.gmra.mxu2 %vm234_vm1, %v233_v17 }
 0x16b   : > { %674 = vmatmul.msk.f32.gmra.mxu3 %vm234_vm1, %v231_v13 }
 0x173   : > { %675 = vmatmul.msk.f32.gmra.mxu3 %vm234_vm1, %v232_v15 }
 0x17b   : > { %676 = vmatmul.msk.f32.gmra.mxu3 %vm234_vm1, %v233_v17 }
 0x1d4   : > { %v436_v32 = vpop.f32.mrf.mxu2 }
 0x1d5   : > { %665 = vst.msk [vmem:[%s1010_s7 + $0x40] sm:$0xff] %vm276_vm2, %v436_v32 }
 0x1dc   : > { %v439_v33 = vpop.f32.mrf.mxu2 }
 0x1dd   : > { %666 = vst.msk [vmem:[%s1010_s7 + $0x48] sm:$0xff] %vm276_vm2, %v439_v33 }
 0x1e4   : > { %v442_v34 = vpop.f32.mrf.mxu2 }
 0x1e5   : > { %667 = vst.msk [vmem:[%s1010_s7 + $0x50] sm:$0xff] %vm276_vm2, %v442_v34 }
 0x1e6   : > { %v522_v35 = vpop.f32.mrf.mxu3 }
 0x1e7   : > { %677 = vst.msk [vmem:[%s1010_s7 + $0x60] sm:$0xff] %vm276_vm2, %v522_v35 }
 0x1ec   : > { %v445_v36 = vpop.f32.mrf.mxu2 }
 0x1ed   : > { %668 = vst.msk [vmem:[%s1010_s7 + $0x58] sm:$0xff] %vm276_vm2, %v445_v36 }
 0x1ee   : > { %v525_v37 = vpop.f32.mrf.mxu3 }
 0x1ef   : > { %678 = vst.msk [vmem:[%s1010_s7 + $0x68] sm:$0xff] %vm276_vm2, %v525_v37 }
 0x1f6   : > { %v528_v38 = vpop.f32.mrf.mxu3 }
 0x1f7   : > { %679 = vst.msk [vmem:[%s1010_s7 + $0x70] sm:$0xff] %vm276_vm2, %v528_v38 }
 0x1fe   : > { %v531_v39 = vpop.f32.mrf.mxu3 }
 0x1ff   : > { %680 = vst.msk [vmem:[%s1010_s7 + $0x78] sm:$0xff] %vm276_vm2, %v531_v39 }
 0x200   : > { %800 = shalt.err (!%p797_p4)
}
 0x201   : > { %s843_s29 = smov 128   ;;  %s844_s30 = smov 8  }
 0x202   : > { %695 = dma.vmem_to_hbm [thread:$0]  (%p915_p11), %s554_s11, 2048, %s556_s23, %s540_s17, %s843_s29, %s843_s29, %s844_s30  }
 0x203 PF: > { %s570_s4 = sand.u32 1, %s827_s12   ;;  %p1095_p7 = scmp.ge.s32.totalorder %s839_s15, 2 }
 0x204   : > { %s571_s5 = scalar_lea.sflag [#allocation4], %s570_s4 }
 0x205   : > { %p702_p5 = pnand %p1095_p7, %p919_p12 }
 0x207   : > { %p703_p8 = pneg %p702_p5 }
 0x209   : > { %822 = dma.done.wait (%p703_p8), %s571_s5, 2048  }
 0x20a   : > { %824 = vsyncadd (%p703_p8), %s571_s5, 4294965248  ;;  %p16_p10 = scmp.ge.s32.totalorder %s890_s18, 4   ;;  %s1096_s12 = smov %s831_s13 }
 0x20b   : > { %s1097_s13 = smov %s835_s14  ;;  %s1098_s14 = smov %s902_s21 }
 0x20c   : > { %s1099_s15 = smov %s890_s18  ;;  %18 = sbr.rel (!%p16_p10) target bundleno = 5 (0x5), region = 83 }
 0x211   :  { %577 = vsyncpa [#allocation3], 1 }
 0x212   :  { %579 = vsyncpa [#allocation3 + $0x1], 1 }
 0x213   :  { %580 = vsyncpa [#allocation4], 1 }
 0x214   :  { %582 = vsyncpa [#allocation4 + $0x1], 1 }

</bundles_post_ra>
